<compile_context>
chip_gen: v6e
topology: v6e:2x2x1
jax: 0.10.0
libtpu: 0.0.40
codegen_flags: <defaults>
</compile_context>

<pallas_src>
import functools

import jax
import jax.numpy as jnp
from jax import lax
from jax.experimental import pallas as pl
from jax.experimental.pallas import tpu as pltpu


# ----------------------------- helpers (glue) -----------------------------

def _fold_bn(gamma, beta, mean, var, eps=1e-5):
    scale = gamma / jnp.sqrt(var + eps)
    bias = beta - mean * scale
    return scale, bias


def _group_conv_dense_taps(w_pt, G):
    """PyTorch grouped conv weight (Cout, Cin//G, 3, 3) -> dense (9, Cin, Cout)
    per-tap matmul weights (block-diagonal; zeros outside each group block)."""
    cout, cin_g, kh, kw = w_pt.shape
    cout_g = cout // G
    cin = cin_g * G
    dense = jnp.zeros((kh, kw, cin, cout), jnp.float32)
    for g in range(G):
        blk = jnp.transpose(w_pt[g * cout_g:(g + 1) * cout_g], (2, 3, 1, 0))
        dense = dense.at[:, :, g * cin_g:(g + 1) * cin_g,
                         g * cout_g:(g + 1) * cout_g].set(blk)
    return dense.reshape(kh * kw, cin, cout)


def _vmem_cap():
    try:
        return int(pltpu.get_tpu_info().vmem_capacity_bytes)
    except Exception:
        return 64 << 20          # be conservative (v7x-sized) if the query fails


def _row_tile_target():
    # v5e/v6e (128 MiB VMEM): bigger row tiles amortize the ~0.35us/step grid
    # overhead; v7x (64 MiB): keep the double-buffered working set moderate.
    return 2048 if _vmem_cap() >= (96 << 20) else 1024


def _pick_tile(n, target, min_grid=1):
    """Largest tile (mult of 8) <= target dividing n with >= min_grid steps."""
    for t in (2048, 1024, 768, 512, 384, 256, 192, 128, 96, 64, 32, 16, 8):
        if t <= target and n % t == 0 and n // t >= min_grid:
            return t
    return n


def _cparams(dims, block_bytes):
    # Scoped-VMEM limit sized from the (double-buffered) per-step working set,
    # capped at half the physical VMEM so the compiler keeps scratch headroom
    # (matters on v7x's 64 MiB; v5e/v6e have 128 MiB).
    cap = _vmem_cap()
    limit = int(min(cap // 2, max(16 << 20, 4 * block_bytes)))
    return pltpu.CompilerParams(dimension_semantics=dims,
                                vmem_limit_bytes=limit)


# ----------------------------- Pallas kernels -----------------------------

def _pw_relu_kernel(x_ref, w_ref, b_ref, o_ref):
    # 1x1 conv (BN scale pre-folded into w, bf16) + bias + ReLU, bf16 out.
    y = jnp.dot(x_ref[...], w_ref[...], preferred_element_type=jnp.float32)
    o_ref[...] = jnp.maximum(y + b_ref[...], 0.0).astype(o_ref.dtype)


def _gconv2_kernel(hp_ref, w_ref, b_ref, y_ref, gap_ref, col_ref,
                   *, dil, H, W, C):
    # Both grouped dilated 3x3 branches at once on one padded image.
    #   hp_ref : (1, H+2d, W+2d, C)  bf16   w_ref : (9*C, 2*Cout) bf16
    #   y_ref  : (1, H*W, 2*Cout)    bf16   gap_ref: (1, 1, 2*Cout) f32
    #   col_ref: (H*W, 9*C)          bf16 VMEM scratch (im2col tile)
    t = 0
    for ky in range(3):
        r0 = ky * dil
        for kx in range(3):
            c0 = kx * dil
            win = hp_ref[0, r0:r0 + H, c0:c0 + W, :].reshape(H * W, C)
            col_ref[:, t * C:(t + 1) * C] = win
            t += 1
    # single K=9*C, N=2*Cout MXU dot feeding both branches
    acc = jnp.dot(col_ref[...], w_ref[...], preferred_element_type=jnp.float32)
    y16 = jnp.maximum(acc + b_ref[...], 0.0).astype(y_ref.dtype)
    y_ref[0] = y16
    # fused per-image GAP channel sums (no extra HBM pass over y1/y2)
    gap_ref[0] = jnp.sum(y16.astype(jnp.float32), axis=0, keepdims=True)


def _fuse_kernel(gap_ref, w1_ref, b1_ref, w2_ref, y12_ref, w3_ref, b3_ref,
                 r_ref, o_ref, *, C, inv_hw):
    # SK attention (tiny -- two small dots, recomputed per tile) followed by
    # V = a1*y1 + a2*y2 ; folded(BN -> 1x1 conv -> BN) ; + residual ; ReLU.
    g = gap_ref[0]                                     # (1, 2C) f32 GAP sums
    s = (g[:, :C] + g[:, C:]) * inv_hw                 # mean of U = y1 + y2
    z = jnp.dot(s, w1_ref[...], preferred_element_type=jnp.float32) + b1_ref[...]
    z = jnp.maximum(z, 0.0)
    a = jnp.dot(z, w2_ref[...], preferred_element_type=jnp.float32)   # (1, 2C)
    a1, a2 = a[:, :C], a[:, C:]
    m = jnp.maximum(a1, a2)
    e1 = jnp.exp(a1 - m)
    e2 = jnp.exp(a2 - m)
    inv = 1.0 / (e1 + e2)                              # exact 2-way softmax
    a1 = e1 * inv
    a2 = e2 * inv

    y12 = y12_ref[0].astype(jnp.float32)               # (thw, 2C)
    V = (y12[:, :C] * a1 + y12[:, C:] * a2).astype(jnp.bfloat16)
    fea = jnp.dot(V, w3_ref[...], preferred_element_type=jnp.float32)
    o_ref[0] = jnp.maximum(fea + b3_ref[...] + r_ref[0].astype(jnp.float32), 0.0)


# ----------------------------- wrappers -----------------------------

def pw_relu(x16, w16, bias):
    N, cin = x16.shape
    cout = w16.shape[1]
    tm = _pick_tile(N, target=_row_tile_target(), min_grid=2)
    blk = 2 * (tm * cin + cin * cout + tm * cout) + 4 * cout
    return pl.pallas_call(
        _pw_relu_kernel,
        out_shape=jax.ShapeDtypeStruct((N, cout), jnp.bfloat16),
        grid=(N // tm,),
        in_specs=[
            pl.BlockSpec((tm, cin), lambda i: (i, 0)),
            pl.BlockSpec((cin, cout), lambda i: (0, 0)),
            pl.BlockSpec((1, cout), lambda i: (0, 0)),
        ],
        out_specs=pl.BlockSpec((tm, cout), lambda i: (i, 0)),
        compiler_params=_cparams(("parallel",), blk),
    )(x16, w16, bias.reshape(1, cout))


def gconv_branches(hp16, w_taps16, b_taps, *, dil, H, W):
    # NOTE: each grid step handles one full (small) padded image; for larger
    # spatial sizes this would become a row-tiled grid with halo windows.
    B, Hp, Wp, C = hp16.shape
    m2c = w_taps16.shape[1]
    HW = H * W
    kernel = functools.partial(_gconv2_kernel, dil=dil, H=H, W=W, C=C)
    blk = (2 * Hp * Wp * C + 2 * 9 * C * m2c + 2 * HW * m2c
           + 2 * HW * 9 * C + 8 * m2c)
    y12, gap = pl.pallas_call(
        kernel,
        out_shape=(jax.ShapeDtypeStruct((B, HW, m2c), jnp.bfloat16),
                   jax.ShapeDtypeStruct((B, 1, m2c), jnp.float32)),
        grid=(B,),
        in_specs=[
            pl.BlockSpec((1, Hp, Wp, C), lambda b: (b, 0, 0, 0)),
            pl.BlockSpec((9 * C, m2c), lambda b: (0, 0)),
            pl.BlockSpec((1, m2c), lambda b: (0, 0)),
        ],
        out_specs=(pl.BlockSpec((1, HW, m2c), lambda b: (b, 0, 0)),
                   pl.BlockSpec((1, 1, m2c), lambda b: (b, 0, 0))),
        scratch_shapes=[pltpu.VMEM((HW, 9 * C), jnp.bfloat16)],
        compiler_params=_cparams(("parallel",), blk),
    )(hp16, w_taps16, b_taps)
    return y12, gap


def fuse_output(gap12, w1, b1, w2, y12, w3, b3, res, *, inv_hw):
    B, HW, m2c = y12.shape
    C = m2c // 2
    d = w1.shape[1]
    cout = w3.shape[1]
    # keep >= 2 parallel steps overall so both v7x TensorCores are busy
    thw = _pick_tile(HW, target=_row_tile_target(),
                     min_grid=1 if B % 2 == 0 else 2)
    nt = HW // thw
    kernel = functools.partial(_fuse_kernel, C=C, inv_hw=inv_hw)
    blk = (4 * m2c + 4 * (C * d + d + d * m2c) + 2 * thw * m2c
           + 2 * C * cout + 4 * cout + 2 * thw * cout + 4 * thw * cout)
    return pl.pallas_call(
        kernel,
        out_shape=jax.ShapeDtypeStruct((B, HW, cout), jnp.float32),
        grid=(B, nt),
        in_specs=[
            pl.BlockSpec((1, 1, m2c), lambda b, j: (b, 0, 0)),     # GAP sums
            pl.BlockSpec((C, d), lambda b, j: (0, 0)),             # fc1 (folded)
            pl.BlockSpec((1, d), lambda b, j: (0, 0)),             # fc1 bias
            pl.BlockSpec((d, m2c), lambda b, j: (0, 0)),           # fc2
            pl.BlockSpec((1, thw, m2c), lambda b, j: (b, j, 0)),   # y1||y2
            pl.BlockSpec((C, cout), lambda b, j: (0, 0)),          # folded 1x1
            pl.BlockSpec((1, cout), lambda b, j: (0, 0)),          # folded bias
            pl.BlockSpec((1, thw, cout), lambda b, j: (b, j, 0)),  # residual
        ],
        out_specs=pl.BlockSpec((1, thw, cout), lambda b, j: (b, j, 0)),
        compiler_params=_cparams(("parallel", "parallel"), blk),
    )(gap12, w1, b1.reshape(1, d), w2, y12, w3, b3.reshape(1, cout), res)


# ----------------------------- parameters -----------------------------

def init_params(key, inplanes, D=1, M=2, G=32, L=32, r=16):
    assert M == 2, "kernels implement the M=2 instantiation of SKConv_ab"
    planes = inplanes // 2
    assert planes % G == 0
    d = max(planes // r, L)
    ks = jax.random.split(key, 12)

    def w(k, shape, s=0.1):
        return s * jax.random.normal(k, shape, jnp.float32)

    def bn(k, c):
        k1, k2, k3, k4 = jax.random.split(k, 4)
        gamma = 1.0 + 0.1 * jax.random.normal(k1, (c,), jnp.float32)
        beta = 0.1 * jax.random.normal(k2, (c,), jnp.float32)
        mean = 0.1 * jax.random.normal(k3, (c,), jnp.float32)
        var = 1.0 + 0.1 * jax.random.uniform(k4, (c,), jnp.float32)
        return gamma, beta, mean, var

    return dict(
        planes=planes, d=d, M=M, G=G, D=D,
        w0=w(ks[0], (inplanes, planes)),
        bn0=bn(ks[1], planes),
        wb=[w(ks[2 + i], (planes, planes // G, 3, 3)) for i in range(M)],
        bnb=[bn(ks[4 + i], planes) for i in range(M)],
        w_fc1=w(ks[6], (planes, d)),
        bn_fc1=bn(ks[7], d),
        w_fc2=w(ks[8], (d, M * planes)),
        bn_a=bn(ks[9], planes),
        w3=w(ks[10], (planes, inplanes)),
        bn3=bn(ks[11], inplanes),
    )


# ----------------------------- forward passes -----------------------------

def skunit_forward_pallas(x_nchw, p):
    B, Cin, H, W = x_nchw.shape
    planes, G, D = p["planes"], p["G"], p["D"]
    HW = H * W

    # boundary layout conversion + bf16 cast (single fused XLA op)
    x_nhwc16 = jnp.transpose(x_nchw, (0, 2, 3, 1)).astype(jnp.bfloat16)
    x_flat16 = x_nhwc16.reshape(B * HW, Cin)

    # 1x1 conv + BN + ReLU (BN scale folded into the bf16 weight)
    s0, b0 = _fold_bn(*p["bn0"])
    w0f16 = (p["w0"] * s0[None, :]).astype(jnp.bfloat16)
    h16 = pw_relu(x_flat16, w0f16, b0)                       # (BHW, planes) bf16

    # pad once; the fused-branch kernel reads the padded image in place
    hp16 = jnp.pad(h16.reshape(B, H, W, planes),
                   ((0, 0), (D, D), (D, D), (0, 0)))

    # both branch weights (block-diagonal grouped conv, folded BN scale),
    # concatenated along the output-channel axis -> one K=9C, N=2C dot
    wt, bt = [], []
    for i in range(p["M"]):
        sb, bb = _fold_bn(*p["bnb"][i])
        dense = _group_conv_dense_taps(p["wb"][i], G) * sb[None, None, :]
        wt.append(dense.reshape(9 * planes, planes))
        bt.append(bb)
    w_taps16 = jnp.concatenate(wt, axis=1).astype(jnp.bfloat16)   # (9C, 2C)
    b_taps = jnp.concatenate(bt).reshape(1, 2 * planes)           # f32

    y12_16, gap12 = gconv_branches(hp16, w_taps16, b_taps, dil=D, H=H, W=W)

    # attention weights (fc1 folded with its BN) + fused epilogue weights
    s1, b1 = _fold_bn(*p["bn_fc1"])
    w1f = p["w_fc1"] * s1[None, :]
    sa, ba = _fold_bn(*p["bn_a"])
    s3, b3 = _fold_bn(*p["bn3"])
    w3f16 = ((sa[:, None] * p["w3"]) * s3[None, :]).astype(jnp.bfloat16)
    b3f = (ba @ p["w3"]) * s3 + b3

    out_nhwc = fuse_output(gap12, w1f, b1, p["w_fc2"], y12_16,
                           w3f16, b3f, x_nhwc16.reshape(B, HW, Cin),
                           inv_hw=1.0 / HW)
    return jnp.transpose(out_nhwc.reshape(B, H, W, Cin), (0, 3, 1, 2))


def skunit_forward_ref(x_nchw, p, eps=1e-5):
    """Pure-JAX reference (eval-mode BN).  Matmul/conv operands are rounded to
    bf16 at the same points the Pallas path stores/casts, with f32 (HIGHEST)
    accumulation, so the correctness check below can be tight."""
    f32 = jnp.float32
    hi = lax.Precision.HIGHEST

    def q(t):                       # bf16 operand/storage rounding, f32 math
        return t.astype(jnp.bfloat16).astype(f32)

    B, Cin, H, W = x_nchw.shape
    planes, G, D = p["planes"], p["G"], p["D"]
    x = q(jnp.transpose(x_nchw, (0, 2, 3, 1)))

    s0, b0 = _fold_bn(*p["bn0"], eps=eps)
    h = q(jax.nn.relu(jnp.einsum("bhwc,cd->bhwd", x, q(p["w0"] * s0[None, :]),
                                 precision=hi) + b0))
    ys = []
    for i in range(p["M"]):
        sb, bb = _fold_bn(*p["bnb"][i], eps=eps)
        w_hwio = q(jnp.transpose(p["wb"][i], (2, 3, 1, 0))
                   * sb[None, None, None, :])
        y = lax.conv_general_dilated(
            h, w_hwio, (1, 1), [(D, D), (D, D)], rhs_dilation=(D, D),
            dimension_numbers=("NHWC", "HWIO", "NHWC"),
            feature_group_count=G, precision=hi)
        ys.append(q(jax.nn.relu(y + bb)))
    U = ys[0] + ys[1]
    s = jnp.mean(U, axis=(1, 2))                                 # (B, planes)
    s1, b1 = _fold_bn(*p["bn_fc1"], eps=eps)
    z = jax.nn.relu(jnp.dot(s, p["w_fc1"] * s1[None, :], precision=hi) + b1)
    a = jax.nn.softmax(jnp.dot(z, p["w_fc2"], precision=hi)
                       .reshape(B, p["M"], planes), axis=1)
    V = q(ys[0] * a[:, 0][:, None, None, :] + ys[1] * a[:, 1][:, None, None, :])
    sa, ba = _fold_bn(*p["bn_a"], eps=eps)
    s3, b3 = _fold_bn(*p["bn3"], eps=eps)
    w3f = q((sa[:, None] * p["w3"]) * s3[None, :])
    b3f = (ba @ p["w3"]) * s3 + b3
    fea = jnp.einsum("bhwc,cd->bhwd", V, w3f, precision=hi) + b3f
    out = jax.nn.relu(fea + x)
    return jnp.transpose(out, (0, 3, 1, 2))


# ----------------------------- main -----------------------------

if __name__ == "__main__":
    key = jax.random.PRNGKey(0)
    kx, kp = jax.random.split(key)

    B, inplanes, H, W = 2, 64, 16, 16            # small but module-consistent
    x = jax.random.normal(kx, (B, inplanes, H, W), jnp.float32)
    params = init_params(kp, inplanes, D=1, M=2, G=8, L=32, r=16)

    out = jax.block_until_ready(skunit_forward_pallas(x, params))
    assert out.shape == (B, inplanes, H, W)
    assert out.dtype == jnp.float32

    ref = skunit_forward_ref(x, params)
    err = float(jnp.max(jnp.abs(out - ref)))
    assert err < 2e-3, f"max abs err {err}"

    print("KERNEL_OK")
</pallas_src>

<mosaic_0001>
module attributes {stable_mosaic.version = 11 : i64} {
  func.func @_pw_relu_kernel(%arg0: i32, %arg1: memref<256x64xbf16, #tpu.memory_space<vmem>>, %arg2: memref<64x32xbf16, #tpu.memory_space<vmem>>, %arg3: memref<1x32xf32, #tpu.memory_space<vmem>>, %arg4: memref<256x32xbf16, #tpu.memory_space<vmem>>) attributes {dimension_semantics = [#tpu.dimension_semantics<parallel>], iteration_bounds = array<i64: 2>, scalar_prefetch = 0 : i64, scratch_operands = 0 : i64, tpu.core_type = #tpu.core_type<tc>, window_params = [{transform_indices = @transform_0, window_bounds = array<i64: 256, 64>}, {pipeline_mode = #tpu.pipeline_mode<synchronous>, transform_indices = @transform_1, window_bounds = array<i64: 64, 32>}, {pipeline_mode = #tpu.pipeline_mode<synchronous>, transform_indices = @transform_2, window_bounds = array<i64: 1, 32>}, {transform_indices = @transform_3, window_bounds = array<i64: 256, 32>}]} {
    %c0 = arith.constant 0 : index
    %c0_0 = arith.constant 0 : index
    %0 = vector.load %arg1[%c0, %c0_0] : memref<256x64xbf16, #tpu.memory_space<vmem>>, vector<256x64xbf16>
    %c0_1 = arith.constant 0 : index
    %c0_2 = arith.constant 0 : index
    %1 = vector.load %arg2[%c0_1, %c0_2] : memref<64x32xbf16, #tpu.memory_space<vmem>>, vector<64x32xbf16>
    %cst = arith.constant dense<0.000000e+00> : vector<256x32xf32>
    %2 = tpu.matmul %0, %1, %cst {dimension_numbers = #tpu.dot_dimension_numbers<[1], [0], [0], [1], [0, 0, 1, 1], [], []>} : vector<256x64xbf16>, vector<64x32xbf16>, vector<256x32xf32> -> vector<256x32xf32>
    %c0_3 = arith.constant 0 : index
    %c0_4 = arith.constant 0 : index
    %3 = vector.load %arg3[%c0_3, %c0_4] : memref<1x32xf32, #tpu.memory_space<vmem>>, vector<1x32xf32>
    %4 = vector.broadcast %3 : vector<1x32xf32> to vector<256x32xf32>
    %5 = arith.addf %2, %4 : vector<256x32xf32>
    %cst_5 = arith.constant 0.000000e+00 : f32
    %6 = vector.broadcast %cst_5 : f32 to vector<256x32xf32>
    %7 = arith.maximumf %5, %6 : vector<256x32xf32>
    %8 = arith.truncf %7 : vector<256x32xf32> to vector<256x32xbf16>
    %c0_6 = arith.constant 0 : index
    %c0_7 = arith.constant 0 : index
    %9 = vector.load %arg4[%c0_6, %c0_7] : memref<256x32xbf16, #tpu.memory_space<vmem>>, vector<256x32xbf16>
    tpu.vector_store %arg4[%c0_6, %c0_7], %8 {strides = array<i32>} : memref<256x32xbf16, #tpu.memory_space<vmem>>, vector<256x32xbf16>,
    return
  }
  func.func @transform_0(%arg0: i32) -> (i32, i32) {
    %c0_i32 = arith.constant 0 : i32
    %c0_i32_0 = arith.constant 0 : i32
    return %arg0, %c0_i32 : i32, i32
  }
  func.func @transform_1(%arg0: i32) -> (i32, i32) {
    %c0_i32 = arith.constant 0 : i32
    %c0_i32_0 = arith.constant 0 : i32
    %c0_i32_1 = arith.constant 0 : i32
    return %c0_i32, %c0_i32_0 : i32, i32
  }
  func.func @transform_2(%arg0: i32) -> (i32, i32) {
    %c0_i32 = arith.constant 0 : i32
    %c0_i32_0 = arith.constant 0 : i32
    %c0_i32_1 = arith.constant 0 : i32
    return %c0_i32, %c0_i32_0 : i32, i32
  }
  func.func @transform_3(%arg0: i32) -> (i32, i32) {
    %c0_i32 = arith.constant 0 : i32
    %c0_i32_0 = arith.constant 0 : i32
    return %arg0, %c0_i32 : i32, i32
  }
}

</mosaic_0001>

<bundles_post_ra>
// kernel: tpu_custom_call.1
= control target key start
LH: loop header
LB: loop body
LE: loop exit
PB: predicated region body
PF: predicated region fallthrough
CT: control target
= control target key end

     0   :  { %s1021_s12 = smov 0   ;;  %s1194_s0 = inlined_call_operand.vmem [shape: bf16[512,64], index: 0, kind: input, shape index: {}]   ;;  %s1195_s1 = inlined_call_operand.vmem [shape: bf16[64,32], index: 1, kind: input, shape index: {}]   ;;  %s1196_s2 = inlined_call_operand.vmem [shape: f32[1,32], index: 2, kind: input, shape index: {}]   ;;  %s1197_s3 = inlined_call_operand.vmem [shape: bf16[512,32], index: 3, kind: output, shape index: {}]  }
   0x1 LB: > { %s785_s13 = sadd.s32 4294967295, %s999_s12   ;;  %p789_p0 = scmp.ge.s32.totalorder %s999_s12, 1  ;;  %s999_s12 = sphi %s1021_s12, %s13_s12  }
   0x2   : > { %p138_p1 = scmp.lt.s32.totalorder %s999_s12, 3 }
   0x4   : > { %p139_p2 = pnand %p789_p0, %p138_p1 }
   0x5   : > { %s790_s16 = sshll.u32 (!%p139_p2), %s785_s13, 5 }
   0x6   : > { %142 = sbr.rel (%p139_p2) target bundleno = 259 (0x103), region = 32  ;;  %p163_p3 = scmp.lt.s32.totalorder (!%p139_p2), %s790_s16, 63 }
   0xb   : > { %v973_v0 = vld [vmem:[%s1195_s1 + $0x18] sm:$0xff]   ;;  %v974_v1 = vld [vmem:[%s1195_s1 + $0x10] sm:$0xff]   ;;  %s1199_s16 = smov (!%p163_p3, %s790_s16), 63  ;;  %v975_v2 = vld [vmem:[%s1195_s1 + $0x8] sm:$0xff]   ;;  %vm326_vm0 = vcmask 523264   ;;  %vm696_vm1 = vcmask 257024  }
   0xc   : > { %917 = vmatprep.subr.bf16.mxu0 %v973_v0  ;;  %957 = vmatprep.subr.bf16.mxu1 %v973_v0  ;;  %s791_s21 = sshll.u32 %s1199_s16, 2  ;;  %v976_v3 = vld [vmem:[%s1195_s1] sm:$0xff]  }
   0xd   : > { %918 = vmatpush3.bf16.msra.mxu0 %v973_v0  ;;  %961 = vmatpush3.bf16.msra.mxu1 %v973_v0  ;;  %s1049_s26 = scalar_lea.vmem %s1194_s0, %s791_s21  ;;  %v1086_v20 = vld [vmem:[%s1196_s2] ss:$0 sm:$0xff]  ;;  %s1097_s4 = scalar_lea.vmem %s1197_s3, %s791_s21 }
   0xe   : > { %919 = vmatprep.subr.bf16.mxu0 %v974_v1  ;;  %958 = vmatprep.subr.bf16.mxu1 %v974_v1  ;;  %v977_v4 = vld [vmem:[%s1049_s26] sm:$0xff]   ;;  %v979_v6 = vld [vmem:[%s1049_s26 + $0x8] sm:$0xff]   ;;  %v981_v8 = vld [vmem:[%s1049_s26 + $0x10] sm:$0xff]  }
   0xf   : > { %v978_v5 = vld [vmem:[%s1049_s26 + $0x40] sm:$0xff]   ;;  %925 = vmatprep.mubr.msk.bf16.mxu0 %vm326_vm0, %v977_v4  ;;  %v980_v7 = vld [vmem:[%s1049_s26 + $0x48] sm:$0xff]   ;;  %v982_v9 = vld [vmem:[%s1049_s26 + $0x50] sm:$0xff]  }
  0x10   : > { %941 = vmatprep.mubr.msk.bf16.mxu1 %vm326_vm0, %v978_v5  ;;  %v983_v10 = vld [vmem:[%s1049_s26 + $0x18] sm:$0xff]   ;;  %v985_v12 = vld [vmem:[%s1049_s26 + $0x20] sm:$0xff]   ;;  %v987_v14 = vld [vmem:[%s1049_s26 + $0x28] sm:$0xff]  }
  0x11   : > { %920 = vmatpush3.bf16.msra.mxu0 %v974_v1  ;;  %962 = vmatpush3.bf16.msra.mxu1 %v974_v1  ;;  %v984_v11 = vld [vmem:[%s1049_s26 + $0x58] sm:$0xff]   ;;  %v986_v13 = vld [vmem:[%s1049_s26 + $0x60] sm:$0xff]   ;;  %v988_v15 = vld [vmem:[%s1049_s26 + $0x68] sm:$0xff]  }
  0x12   : > { %921 = vmatprep.subr.bf16.mxu0 %v975_v2  ;;  %959 = vmatprep.subr.bf16.mxu1 %v975_v2  ;;  %v989_v16 = vld [vmem:[%s1049_s26 + $0x30] sm:$0xff]   ;;  %v991_v18 = vld [vmem:[%s1049_s26 + $0x38] sm:$0xff]  }
  0x13   : > { %v990_v17 = vld [vmem:[%s1049_s26 + $0x70] sm:$0xff]   ;;  %v992_v19 = vld [vmem:[%s1049_s26 + $0x78] sm:$0xff]  }
  0x15   : > { %922 = vmatpush3.bf16.msra.mxu0 %v975_v2  ;;  %963 = vmatpush3.bf16.msra.mxu1 %v975_v2 }
  0x16   : > { %923 = vmatprep.subr.bf16.mxu0 %v976_v3  ;;  %960 = vmatprep.subr.bf16.mxu1 %v976_v3 }
  0x19   : > { %924 = vmatpush3.bf16.msra.mxu0 %v976_v3  ;;  %964 = vmatpush3.bf16.msra.mxu1 %v976_v3 }
  0x1c   : > { %926 = vmatmul.mubr.msk.bf16.vlgmr.msra.gmra.mxu0 %vm326_vm0, %v979_v6  ;;  %942 = vmatmul.mubr.msk.bf16.vlgmr.msra.gmra.mxu1 %vm326_vm0, %v980_v7 }
  0x1d   : > { %929 = vmatprep.mubr.msk.bf16.mxu0 %vm326_vm0, %v981_v8  ;;  %945 = vmatprep.mubr.msk.bf16.mxu1 %vm326_vm0, %v982_v9 }
  0x24   : > { %930 = vmatmul.mubr.msk.bf16.gmra.mxu0 %vm326_vm0, %v983_v10  ;;  %946 = vmatmul.mubr.msk.bf16.gmra.mxu1 %vm326_vm0, %v984_v11 }
  0x25   : > { %933 = vmatprep.mubr.msk.bf16.mxu0 %vm326_vm0, %v985_v12  ;;  %949 = vmatprep.mubr.msk.bf16.mxu1 %vm326_vm0, %v986_v13 }
  0x2c   : > { %934 = vmatmul.mubr.msk.bf16.gmra.mxu0 %vm326_vm0, %v987_v14  ;;  %950 = vmatmul.mubr.msk.bf16.gmra.mxu1 %vm326_vm0, %v988_v15 }
  0x2d   : > { %937 = vmatprep.mubr.msk.bf16.mxu0 %vm326_vm0, %v989_v16  ;;  %953 = vmatprep.mubr.msk.bf16.mxu1 %vm326_vm0, %v990_v17 }
  0x34   : > { %938 = vmatmul.mubr.msk.bf16.gmra.mxu0 %vm326_vm0, %v991_v18  ;;  %954 = vmatmul.mubr.msk.bf16.gmra.mxu1 %vm326_vm0, %v992_v19 }
  0xdc   : > { %v927_v21 = vpop.f32.mrf.mxu0  ;;  %v943_v22 = vpop.f32.mrf.mxu1 }
  0xdd   : > { %v418_v23 = vadd.f32 %v927_v21, %v1086_v20  ;;  %v482_v24 = vadd.f32 %v943_v22, %v1086_v20 }
  0xde   : > { %v409_v25 = vpop.f32.mrf.mxu0  ;;  %v473_v26 = vpop.f32.mrf.mxu1 }
  0xdf   : > { %v538_v27 = vmax.f32 %v418_v23, 0.0  ;;  %v554_v28 = vmax.f32 %v482_v24, 0.0  ;;  %v410_v29 = vadd.f32 %v1086_v20, %v409_v25  ;;  %v474_v30 = vadd.f32 %v1086_v20, %v473_v26 }
  0xe0   : > { %v928_v31 = vpop.f32.mrf.mxu0  ;;  %v944_v32 = vpop.f32.mrf.mxu1 }
  0xe1   : > { %v867_v33 = vpack.c.bf16 %v538_v27, %v538_v27  ;;  %v883_v34 = vpack.c.bf16 %v554_v28, %v554_v28  ;;  %v536_v35 = vmax.f32 %v410_v29, 0.0  ;;  %v552_v36 = vmax.f32 %v474_v30, 0.0 }
  0xe2   : > { %v421_v37 = vadd.f32 %v928_v31, %v1086_v20  ;;  %v485_v38 = vadd.f32 %v944_v32, %v1086_v20  ;;  %v412_v39 = vpop.f32.mrf.mxu0  ;;  %v476_v40 = vpop.f32.mrf.mxu1 }
  0xe3   : > { %699 = vst.msk [vmem:[%s1097_s4 + $0x8] sm:$0xf] %vm696_vm1, %v867_v33  ;;  %715 = vst.msk [vmem:[%s1097_s4 + $0x48] sm:$0xf] %vm696_vm1, %v883_v34  ;;  %v865_v41 = vpack.c.bf16 %v536_v35, %v536_v35  ;;  %v881_v42 = vpack.c.bf16 %v552_v36, %v552_v36  ;;  %v413_v43 = vadd.f32 %v1086_v20, %v412_v39 }
  0xe4   : > { %v477_v44 = vadd.f32 %v1086_v20, %v476_v40  ;;  %v539_v45 = vmax.f32 %v421_v37, 0.0  ;;  %v555_v46 = vmax.f32 %v485_v38, 0.0  ;;  %v931_v47 = vpop.f32.mrf.mxu0  ;;  %v947_v48 = vpop.f32.mrf.mxu1 }
  0xe5   : > { %697 = vst.msk [vmem:[%s1097_s4] sm:$0xf] %vm696_vm1, %v865_v41  ;;  %713 = vst.msk [vmem:[%s1097_s4 + $0x40] sm:$0xf] %vm696_vm1, %v881_v42  ;;  %v537_v49 = vmax.f32 %v413_v43, 0.0  ;;  %v434_v51 = vadd.f32 %v931_v47, %v1086_v20  ;;  %v498_v52 = vadd.f32 %v947_v48, %v1086_v20 }
  0xe6   : > { %v553_v50 = vmax.f32 %v477_v44, 0.0  ;;  %v868_v53 = vpack.c.bf16 %v539_v45, %v539_v45  ;;  %v884_v54 = vpack.c.bf16 %v555_v46, %v555_v46  ;;  %v425_v55 = vpop.f32.mrf.mxu0  ;;  %v489_v56 = vpop.f32.mrf.mxu1 }
  0xe7   : > { %v866_v57 = vpack.c.bf16 %v537_v49, %v537_v49  ;;  %v542_v59 = vmax.f32 %v434_v51, 0.0  ;;  %v558_v60 = vmax.f32 %v498_v52, 0.0  ;;  %v426_v61 = vadd.f32 %v1086_v20, %v425_v55 }
  0xe8   : > { %v882_v58 = vpack.c.bf16 %v553_v50, %v553_v50  ;;  %700 = vst.msk [vmem:[%s1097_s4 + $0xc] sm:$0xf] %vm696_vm1, %v868_v53  ;;  %716 = vst.msk [vmem:[%s1097_s4 + $0x4c] sm:$0xf] %vm696_vm1, %v884_v54  ;;  %v490_v62 = vadd.f32 %v1086_v20, %v489_v56  ;;  %v932_v63 = vpop.f32.mrf.mxu0  ;;  %v948_v0 = vpop.f32.mrf.mxu1 }
  0xe9   : > { %698 = vst.msk [vmem:[%s1097_s4 + $0x4] sm:$0xf] %vm696_vm1, %v866_v57  ;;  %v871_v1 = vpack.c.bf16 %v542_v59, %v542_v59  ;;  %v887_v2 = vpack.c.bf16 %v558_v60, %v558_v60  ;;  %v437_v3 = vadd.f32 %v932_v63, %v1086_v20  ;;  %v501_v4 = vadd.f32 %v948_v0, %v1086_v20 }
  0xea   : > { %714 = vst.msk [vmem:[%s1097_s4 + $0x44] sm:$0xf] %vm696_vm1, %v882_v58  ;;  %v540_v5 = vmax.f32 %v426_v61, 0.0  ;;  %v556_v6 = vmax.f32 %v490_v62, 0.0  ;;  %v428_v7 = vpop.f32.mrf.mxu0  ;;  %v492_v8 = vpop.f32.mrf.mxu1 }
  0xeb   : > { %703 = vst.msk [vmem:[%s1097_s4 + $0x18] sm:$0xf] %vm696_vm1, %v871_v1  ;;  %719 = vst.msk [vmem:[%s1097_s4 + $0x58] sm:$0xf] %vm696_vm1, %v887_v2  ;;  %v543_v9 = vmax.f32 %v437_v3, 0.0  ;;  %v559_v10 = vmax.f32 %v501_v4, 0.0  ;;  %v429_v11 = vadd.f32 %v1086_v20, %v428_v7  ;;  %v493_v12 = vadd.f32 %v1086_v20, %v492_v8 }
  0xec   : > { %v869_v13 = vpack.c.bf16 %v540_v5, %v540_v5  ;;  %v885_v14 = vpack.c.bf16 %v556_v6, %v556_v6  ;;  %v935_v15 = vpop.f32.mrf.mxu0  ;;  %v951_v16 = vpop.f32.mrf.mxu1 }
  0xed   : > { %v872_v17 = vpack.c.bf16 %v543_v9, %v543_v9  ;;  %v888_v18 = vpack.c.bf16 %v559_v10, %v559_v10  ;;  %v541_v19 = vmax.f32 %v429_v11, 0.0  ;;  %v557_v21 = vmax.f32 %v493_v12, 0.0 }
  0xee   : > { %701 = vst.msk [vmem:[%s1097_s4 + $0x10] sm:$0xf] %vm696_vm1, %v869_v13  ;;  %717 = vst.msk [vmem:[%s1097_s4 + $0x50] sm:$0xf] %vm696_vm1, %v885_v14  ;;  %v450_v22 = vadd.f32 %v935_v15, %v1086_v20  ;;  %v514_v23 = vadd.f32 %v951_v16, %v1086_v20  ;;  %v441_v24 = vpop.f32.mrf.mxu0  ;;  %v505_v25 = vpop.f32.mrf.mxu1 }
  0xef   : > { %704 = vst.msk [vmem:[%s1097_s4 + $0x1c] sm:$0xf] %vm696_vm1, %v872_v17  ;;  %720 = vst.msk [vmem:[%s1097_s4 + $0x5c] sm:$0xf] %vm696_vm1, %v888_v18  ;;  %v870_v26 = vpack.c.bf16 %v541_v19, %v541_v19  ;;  %v886_v27 = vpack.c.bf16 %v557_v21, %v557_v21  ;;  %v442_v28 = vadd.f32 %v1086_v20, %v441_v24 }
  0xf0   : > { %v506_v29 = vadd.f32 %v1086_v20, %v505_v25  ;;  %v546_v30 = vmax.f32 %v450_v22, 0.0  ;;  %v562_v31 = vmax.f32 %v514_v23, 0.0  ;;  %v936_v32 = vpop.f32.mrf.mxu0  ;;  %v952_v33 = vpop.f32.mrf.mxu1 }
  0xf1   : > { %702 = vst.msk [vmem:[%s1097_s4 + $0x14] sm:$0xf] %vm696_vm1, %v870_v26  ;;  %718 = vst.msk [vmem:[%s1097_s4 + $0x54] sm:$0xf] %vm696_vm1, %v886_v27  ;;  %v544_v34 = vmax.f32 %v442_v28, 0.0  ;;  %v453_v36 = vadd.f32 %v936_v32, %v1086_v20  ;;  %v517_v37 = vadd.f32 %v952_v33, %v1086_v20 }
  0xf2   : > { %v560_v35 = vmax.f32 %v506_v29, 0.0  ;;  %v875_v38 = vpack.c.bf16 %v546_v30, %v546_v30  ;;  %v891_v39 = vpack.c.bf16 %v562_v31, %v562_v31  ;;  %v444_v40 = vpop.f32.mrf.mxu0  ;;  %v508_v41 = vpop.f32.mrf.mxu1 }
  0xf3   : > { %v873_v42 = vpack.c.bf16 %v544_v34, %v544_v34  ;;  %v547_v44 = vmax.f32 %v453_v36, 0.0  ;;  %v563_v45 = vmax.f32 %v517_v37, 0.0  ;;  %v445_v46 = vadd.f32 %v1086_v20, %v444_v40 }
  0xf4   : > { %v889_v43 = vpack.c.bf16 %v560_v35, %v560_v35  ;;  %707 = vst.msk [vmem:[%s1097_s4 + $0x28] sm:$0xf] %vm696_vm1, %v875_v38  ;;  %723 = vst.msk [vmem:[%s1097_s4 + $0x68] sm:$0xf] %vm696_vm1, %v891_v39  ;;  %v509_v47 = vadd.f32 %v1086_v20, %v508_v41  ;;  %v939_v48 = vpop.f32.mrf.mxu0  ;;  %v955_v49 = vpop.f32.mrf.mxu1 }
  0xf5   : > { %705 = vst.msk [vmem:[%s1097_s4 + $0x20] sm:$0xf] %vm696_vm1, %v873_v42  ;;  %v876_v50 = vpack.c.bf16 %v547_v44, %v547_v44  ;;  %v892_v51 = vpack.c.bf16 %v563_v45, %v563_v45  ;;  %v466_v52 = vadd.f32 %v939_v48, %v1086_v20  ;;  %v530_v53 = vadd.f32 %v955_v49, %v1086_v20 }
  0xf6   : > { %721 = vst.msk [vmem:[%s1097_s4 + $0x60] sm:$0xf] %vm696_vm1, %v889_v43  ;;  %v545_v54 = vmax.f32 %v445_v46, 0.0  ;;  %v561_v55 = vmax.f32 %v509_v47, 0.0  ;;  %v457_v56 = vpop.f32.mrf.mxu0  ;;  %v521_v57 = vpop.f32.mrf.mxu1 }
  0xf7   : > { %708 = vst.msk [vmem:[%s1097_s4 + $0x2c] sm:$0xf] %vm696_vm1, %v876_v50  ;;  %724 = vst.msk [vmem:[%s1097_s4 + $0x6c] sm:$0xf] %vm696_vm1, %v892_v51  ;;  %v550_v58 = vmax.f32 %v466_v52, 0.0  ;;  %v566_v59 = vmax.f32 %v530_v53, 0.0  ;;  %v458_v60 = vadd.f32 %v1086_v20, %v457_v56  ;;  %v522_v61 = vadd.f32 %v1086_v20, %v521_v57 }
  0xf8   : > { %v874_v62 = vpack.c.bf16 %v545_v54, %v545_v54  ;;  %v890_v63 = vpack.c.bf16 %v561_v55, %v561_v55  ;;  %v940_v0 = vpop.f32.mrf.mxu0  ;;  %v956_v1 = vpop.f32.mrf.mxu1 }
  0xf9   : > { %v879_v2 = vpack.c.bf16 %v550_v58, %v550_v58  ;;  %v895_v3 = vpack.c.bf16 %v566_v59, %v566_v59  ;;  %v548_v4 = vmax.f32 %v458_v60, 0.0  ;;  %v564_v5 = vmax.f32 %v522_v61, 0.0 }
  0xfa   : > { %706 = vst.msk [vmem:[%s1097_s4 + $0x24] sm:$0xf] %vm696_vm1, %v874_v62  ;;  %722 = vst.msk [vmem:[%s1097_s4 + $0x64] sm:$0xf] %vm696_vm1, %v890_v63  ;;  %v469_v6 = vadd.f32 %v940_v0, %v1086_v20  ;;  %v533_v7 = vadd.f32 %v956_v1, %v1086_v20  ;;  %v460_v8 = vpop.f32.mrf.mxu0  ;;  %v524_v9 = vpop.f32.mrf.mxu1 }
  0xfb   : > { %711 = vst.msk [vmem:[%s1097_s4 + $0x38] sm:$0xf] %vm696_vm1, %v879_v2  ;;  %727 = vst.msk [vmem:[%s1097_s4 + $0x78] sm:$0xf] %vm696_vm1, %v895_v3  ;;  %v877_v10 = vpack.c.bf16 %v548_v4, %v548_v4  ;;  %v893_v11 = vpack.c.bf16 %v564_v5, %v564_v5  ;;  %v461_v12 = vadd.f32 %v1086_v20, %v460_v8 }
  0xfc   : > { %v525_v13 = vadd.f32 %v1086_v20, %v524_v9  ;;  %v551_v14 = vmax.f32 %v469_v6, 0.0  ;;  %v567_v15 = vmax.f32 %v533_v7, 0.0 }
  0xfd   : > { %709 = vst.msk [vmem:[%s1097_s4 + $0x30] sm:$0xf] %vm696_vm1, %v877_v10  ;;  %725 = vst.msk [vmem:[%s1097_s4 + $0x70] sm:$0xf] %vm696_vm1, %v893_v11  ;;  %v549_v16 = vmax.f32 %v461_v12, 0.0 }
  0xfe   : > { %v565_v17 = vmax.f32 %v525_v13, 0.0  ;;  %v880_v18 = vpack.c.bf16 %v551_v14, %v551_v14  ;;  %v896_v19 = vpack.c.bf16 %v567_v15, %v567_v15 }
  0xff   : > { %v878_v21 = vpack.c.bf16 %v549_v16, %v549_v16 }
 0x100   : > { %v894_v22 = vpack.c.bf16 %v565_v17, %v565_v17  ;;  %712 = vst.msk [vmem:[%s1097_s4 + $0x3c] sm:$0xf] %vm696_vm1, %v880_v18  ;;  %728 = vst.msk [vmem:[%s1097_s4 + $0x7c] sm:$0xf] %vm696_vm1, %v896_v19 }
 0x101   : > { %710 = vst.msk [vmem:[%s1097_s4 + $0x34] sm:$0xf] %vm696_vm1, %v878_v21 }
 0x102   : > { %726 = vst.msk [vmem:[%s1097_s4 + $0x74] sm:$0xf] %vm696_vm1, %v894_v22 }
 0x103 PF: > { %s13_s12 = sadd.s32 1, %s999_s12  }
 0x104   : > { %p10_p4 = scmp.ge.s32.totalorder %s13_s12, 4  }
 0x106   :  { %12 = sbr.rel (!%p10_p4) target bundleno = 1 (0x1), region = 62 }

</bundles_post_ra>
